<compile_context>
chip_gen: v7x
topology: tpu7x:2x2x1
jax: 0.10.0
libtpu: 0.0.40
codegen_flags: <defaults>
</compile_context>

<pallas_src>
import math

import jax
import jax.numpy as jnp
from jax.experimental import pallas as pl
from jax.experimental.pallas import tpu as pltpu

FEATURE_NUM = 16                      # "feature_num" in the PyTorch module
HIDDEN = FEATURE_NUM * 2              # LSTM hidden size (32)
MID = math.ceil(FEATURE_NUM / 2)      # linear2 output size (8)
LANES = 128                           # TPU lane width

GROUPS = 2                            # independent forward() batches per call (grid axis)
BATCH = 128                           # rows per BatchNorm group (one BN group = one batch)


def _ceil8(n):
    return -(-n // 8) * 8


F_PAD = _ceil8(FEATURE_NUM)           # 16
H_PAD = _ceil8(HIDDEN)                # 32
M_PAD = _ceil8(MID)                   # 8

# ---- packed parameter slab: one (N_ROWS, 128) f32 array --------------------
OFF_WG = 0                            # (F_PAD,128)  x -> [i|g|o] gate pre-acts (lanes 0:32/32:64/64:96)
OFF_W1 = OFF_WG + F_PAD               # (H_PAD,128)  linear1, pre-transposed, lane-padded
OFF_W2 = OFF_W1 + H_PAD               # (F_PAD,128)  linear2
OFF_W3 = OFF_W2 + F_PAD               # (M_PAD,128)  linear3 folded to [+wdiff, -wdiff]
OFF_VEC = OFF_W3 + M_PAD              # 8 rows of bias / affine vectors
N_ROWS = OFF_VEC + 8                  # 80 rows  -> 40 KiB total

# rows inside the vector block
R_BGATES, R_GAMMA, R_BETA, R_B1, R_B2, R_B3 = range(6)

assert all(o % 8 == 0 for o in (OFF_WG, OFF_W1, OFF_W2, OFF_W3, OFF_VEC))


def lstm_rnn_kernel(x_ref, p_ref, out_ref):
    x = x_ref[...]                                            # (B, F) f32

    def vec(r):                                               # (1, 128) bias/affine row
        return p_ref[OFF_VEC + r:OFF_VEC + r + 1, :]

    def mm(lhs, row_off, rows):                               # lane-dense matmul vs slab block
        return jnp.dot(lhs, p_ref[row_off:row_off + rows, :],
                       preferred_element_type=jnp.float32)

    # ---- single-step LSTM cell, h0 = c0 = 0 (seq_len == 1) -----------------
    # One merged matmul gives [pre_i | pre_g | pre_o | 0] across the lanes.
    gates = mm(x, OFF_WG, F_PAD) + vec(R_BGATES)              # (B, 128)
    sig = jax.nn.sigmoid(gates)                               # i at lanes 0:H, o at 2H:3H
    th = jnp.tanh(gates)                                      # g at lanes H:2H
    g_al = pltpu.roll(th, shift=LANES - HIDDEN, axis=1)       # g -> lanes 0:H
    o_al = pltpu.roll(sig, shift=LANES - 2 * HIDDEN, axis=1)  # o -> lanes 0:H
    # h real in lanes 0:H; pad lanes hold bounded garbage (zeroed later by gamma/beta).
    h = o_al * jnp.tanh(sig * g_al)                           # (B, 128)

    # ---- BatchNorm1d (train mode -> batch statistics, biased variance) -----
    mean = jnp.mean(h, axis=0, keepdims=True)
    cent = h - mean
    var = jnp.mean(cent * cent, axis=0, keepdims=True)
    # gamma/beta are exactly zero in pad lanes => xn pad lanes == 0 exactly.
    xn = cent * jax.lax.rsqrt(var + 1e-5) * vec(R_GAMMA) + vec(R_BETA)

    # ---- linear1 -> relu -> linear2 -> relu -> linear3 + softmax(2) --------
    y1 = jnp.maximum(mm(xn[:, :H_PAD], OFF_W1, H_PAD) + vec(R_B1), 0.0)
    y2 = jnp.maximum(mm(y1[:, :F_PAD], OFF_W2, F_PAD) + vec(R_B2), 0.0)
    # last layer packed as [+wdiff, -wdiff] -> lane0 = d, lane1 = -d, rest 0;
    # softmax over 2 classes == (sigmoid(d), sigmoid(-d)).
    y3 = mm(y2[:, :M_PAD], OFF_W3, M_PAD) + vec(R_B3)
    out_ref[...] = jax.nn.sigmoid(y3).astype(out_ref.dtype)   # lane-dense store


def lstm_rnn_forward(x, packed_params):
    """x: (G, B, FEATURE_NUM) f32 — G independent BN groups of B rows each.
    packed_params: (N_ROWS, 128) f32. Returns (G, B, 2) softmax probabilities."""
    G, B, F = x.shape
    out = pl.pallas_call(
        lstm_rnn_kernel,
        out_shape=jax.ShapeDtypeStruct((G, B, LANES), jnp.float32),
        grid=(G,),
        in_specs=[
            pl.BlockSpec((None, B, F), lambda g: (g, 0, 0)),            # stream x per group
            pl.BlockSpec((N_ROWS, LANES), lambda g: (0, 0)),            # constant -> VMEM-resident
        ],
        out_specs=pl.BlockSpec((None, B, LANES), lambda g: (g, 0, 0)),  # lane-dense writeback
        compiler_params=pltpu.CompilerParams(
            dimension_semantics=("parallel",)),                         # shards across v7x TCs
    )(x, packed_params)
    return out[:, :, :2]


def init_raw_params(key):
    """Deterministic synthetic parameters with PyTorch shapes / uniform init."""
    ks = jax.random.split(key, 10)

    def u(k, shape, bound):
        return jax.random.uniform(k, shape, jnp.float32, -bound, bound)

    bl = 1.0 / math.sqrt(HIDDEN)
    return {
        # nn.LSTM(F, 2F): gate order [i, f, g, o]; W_hh multiplies h0 == 0.
        "w_ih": u(ks[0], (4 * HIDDEN, FEATURE_NUM), bl),
        "b_ih": u(ks[1], (4 * HIDDEN,), bl),
        "b_hh": u(ks[2], (4 * HIDDEN,), bl),
        # nn.BatchNorm1d(2F)
        "gamma": jnp.ones((HIDDEN,), jnp.float32),
        "beta": jnp.zeros((HIDDEN,), jnp.float32),
        # nn.Linear(2F, F)
        "w1": u(ks[3], (FEATURE_NUM, HIDDEN), 1.0 / math.sqrt(HIDDEN)),
        "b1": u(ks[4], (FEATURE_NUM,), 1.0 / math.sqrt(HIDDEN)),
        # nn.Linear(F, ceil(F/2))
        "w2": u(ks[5], (MID, FEATURE_NUM), 1.0 / math.sqrt(FEATURE_NUM)),
        "b2": u(ks[6], (MID,), 1.0 / math.sqrt(FEATURE_NUM)),
        # nn.Linear(ceil(F/2), 2)
        "w3": u(ks[7], (2, MID), 1.0 / math.sqrt(MID)),
        "b3": u(ks[8], (2,), 1.0 / math.sqrt(MID)),
    }


def pack_params(raw):
    """Host-side one-time prep: transpose, fold biases, merge gates, pad, pack."""
    H, F, M = HIDDEN, FEATURE_NUM, MID
    p = jnp.zeros((N_ROWS, LANES), jnp.float32)

    b_gate = raw["b_ih"] + raw["b_hh"]            # folded gate bias
    w_ih = raw["w_ih"]
    # PyTorch gate order [i, f, g, o]; the f gate is dead because c0 == 0.
    w_i, w_g, w_o = w_ih[0:H], w_ih[2 * H:3 * H], w_ih[3 * H:4 * H]
    b_i, b_g, b_o = b_gate[0:H], b_gate[2 * H:3 * H], b_gate[3 * H:4 * H]

    # merged gate block: lanes [0:H]=i, [H:2H]=g, [2H:3H]=o, rest zero
    p = p.at[OFF_WG:OFF_WG + F, 0:H].set(w_i.T)
    p = p.at[OFF_WG:OFF_WG + F, H:2 * H].set(w_g.T)
    p = p.at[OFF_WG:OFF_WG + F, 2 * H:3 * H].set(w_o.T)

    p = p.at[OFF_W1:OFF_W1 + H, :F].set(raw["w1"].T)
    p = p.at[OFF_W2:OFF_W2 + F, :M].set(raw["w2"].T)

    # linear3 + 2-class softmax folded into a signed logit-difference matrix.
    wdiff = raw["w3"][0] - raw["w3"][1]           # (M,)
    bdiff = raw["b3"][0] - raw["b3"][1]
    p = p.at[OFF_W3:OFF_W3 + M, 0].set(wdiff)
    p = p.at[OFF_W3:OFF_W3 + M, 1].set(-wdiff)

    vec = jnp.zeros((8, LANES), jnp.float32)
    vec = vec.at[R_BGATES, 0:H].set(b_i)
    vec = vec.at[R_BGATES, H:2 * H].set(b_g)
    vec = vec.at[R_BGATES, 2 * H:3 * H].set(b_o)
    vec = vec.at[R_GAMMA, :H].set(raw["gamma"])   # pad lanes MUST stay 0 (zeroes pad h)
    vec = vec.at[R_BETA, :H].set(raw["beta"])
    vec = vec.at[R_B1, :F].set(raw["b1"])
    vec = vec.at[R_B2, :M].set(raw["b2"])
    vec = vec.at[R_B3, 0].set(bdiff)
    vec = vec.at[R_B3, 1].set(-bdiff)
    p = p.at[OFF_VEC:OFF_VEC + 8, :].set(vec)
    return p


def reference_forward(x, raw):
    """Pure-JAX reference mirroring the PyTorch forward (train-mode BN, true softmax)."""
    H = HIDDEN
    hp = jax.lax.Precision.HIGHEST

    def one(xg):
        gates = jnp.dot(xg, raw["w_ih"].T, precision=hp) + raw["b_ih"] + raw["b_hh"]
        i = jax.nn.sigmoid(gates[:, :H])
        g = jnp.tanh(gates[:, 2 * H:3 * H])
        o = jax.nn.sigmoid(gates[:, 3 * H:])
        h = o * jnp.tanh(i * g)
        mean = jnp.mean(h, axis=0, keepdims=True)
        var = jnp.mean((h - mean) ** 2, axis=0, keepdims=True)
        xn = (h - mean) / jnp.sqrt(var + 1e-5) * raw["gamma"] + raw["beta"]
        y = jnp.maximum(jnp.dot(xn, raw["w1"].T, precision=hp) + raw["b1"], 0.0)
        y = jnp.maximum(jnp.dot(y, raw["w2"].T, precision=hp) + raw["b2"], 0.0)
        y = jnp.dot(y, raw["w3"].T, precision=hp) + raw["b3"]
        return jax.nn.softmax(y, axis=1)

    return jax.vmap(one)(x)


if __name__ == "__main__":
    key = jax.random.PRNGKey(0)
    kx, kp = jax.random.split(key)
    # The PyTorch forward reshapes to (-1, 1, feature_num); we feed G independent
    # (B, F) batches, each one BatchNorm group (train-mode stats per group).
    x = jax.random.normal(kx, (GROUPS, BATCH, FEATURE_NUM), jnp.float32)
    raw = init_raw_params(kp)
    packed = pack_params(raw)                     # one-time host preprocessing

    out = jax.block_until_ready(lstm_rnn_forward(x, packed))
    ref = reference_forward(x, raw)

    assert out.shape == (GROUPS, BATCH, 2)
    # Tolerance covers MXU default-precision (bf16-pass) f32 matmuls vs the
    # HIGHEST-precision reference; real bugs produce errors >= ~5e-2.
    assert jnp.allclose(out, ref, atol=5e-3, rtol=5e-3), (out, ref)
    print("KERNEL_OK")
</pallas_src>

<mosaic_0001>
module attributes {stable_mosaic.version = 11 : i64} {
  func.func @lstm_rnn_kernel(%arg0: i32, %arg1: memref<1x128x16xf32, #tpu.memory_space<vmem>>, %arg2: memref<80x128xf32, #tpu.memory_space<vmem>>, %arg3: memref<1x128x128xf32, #tpu.memory_space<vmem>>) attributes {dimension_semantics = [#tpu.dimension_semantics<parallel>], iteration_bounds = array<i64: 2>, scalar_prefetch = 0 : i64, scratch_operands = 0 : i64, tpu.core_type = #tpu.core_type<tc>, window_params = [{transform_indices = @transform_0, window_bounds = array<i64: 1, 128, 16>}, {pipeline_mode = #tpu.pipeline_mode<synchronous>, transform_indices = @transform_1, window_bounds = array<i64: 80, 128>}, {transform_indices = @transform_2, window_bounds = array<i64: 1, 128, 128>}]} {
    %c0 = arith.constant 0 : index
    %c0_0 = arith.constant 0 : index
    %c0_1 = arith.constant 0 : index
    %0 = vector.load %arg1[%c0, %c0_0, %c0_1] : memref<1x128x16xf32, #tpu.memory_space<vmem>>, vector<1x128x16xf32>
    %1 = vector.shape_cast %0 : vector<1x128x16xf32> to vector<128x16xf32>
    %c0_2 = arith.constant 0 : index
    %c0_3 = arith.constant 0 : index
    %2 = vector.load %arg2[%c0_2, %c0_3] : memref<80x128xf32, #tpu.memory_space<vmem>>, vector<16x128xf32>
    %cst = arith.constant dense<0.000000e+00> : vector<128x128xf32>
    %3 = tpu.matmul %1, %2, %cst {dimension_numbers = #tpu.dot_dimension_numbers<[1], [0], [0], [1], [0, 0, 1, 1], [], []>} : vector<128x16xf32>, vector<16x128xf32>, vector<128x128xf32> -> vector<128x128xf32>
    %c72 = arith.constant 72 : index
    %c0_4 = arith.constant 0 : index
    %4 = vector.load %arg2[%c72, %c0_4] : memref<80x128xf32, #tpu.memory_space<vmem>>, vector<1x128xf32>
    %5 = vector.broadcast %4 : vector<1x128xf32> to vector<128x128xf32>
    %6 = arith.addf %3, %5 : vector<128x128xf32>
    %7 = arith.negf %6 : vector<128x128xf32>
    %8 = math.exp %7 : vector<128x128xf32>
    %cst_5 = arith.constant 1.000000e+00 : f32
    %9 = vector.broadcast %cst_5 : f32 to vector<128x128xf32>
    %10 = arith.addf %9, %8 : vector<128x128xf32>
    %11 = arith.divf %9, %10 : vector<128x128xf32>
    %12 = math.tanh %6 : vector<128x128xf32>
    %c96_i32 = arith.constant 96 : i32
    %13 = tpu.dynamic_rotate %12 by %c96_i32 dim 1 : vector<128x128xf32>, i32 -> vector<128x128xf32>
    %c64_i32 = arith.constant 64 : i32
    %14 = tpu.dynamic_rotate %11 by %c64_i32 dim 1 : vector<128x128xf32>, i32 -> vector<128x128xf32>
    %15 = arith.mulf %11, %13 : vector<128x128xf32>
    %16 = math.tanh %15 : vector<128x128xf32>
    %17 = arith.mulf %14, %16 : vector<128x128xf32>
    %cst_6 = arith.constant dense<0.000000e+00> : vector<128xf32>
    %18 = vector.multi_reduction <add>, %17, %cst_6 [0] : vector<128x128xf32> to vector<128xf32>
    %19 = vector.shape_cast %18 : vector<128xf32> to vector<1x128xf32>
    %cst_7 = arith.constant 1.280000e+02 : f32
    %20 = vector.broadcast %cst_7 : f32 to vector<1x128xf32>
    %21 = arith.divf %19, %20 : vector<1x128xf32>
    %22 = vector.broadcast %21 : vector<1x128xf32> to vector<128x128xf32>
    %23 = arith.subf %17, %22 : vector<128x128xf32>
    %24 = arith.mulf %23, %23 : vector<128x128xf32>
    %cst_8 = arith.constant dense<0.000000e+00> : vector<128xf32>
    %25 = vector.multi_reduction <add>, %24, %cst_8 [0] : vector<128x128xf32> to vector<128xf32>
    %26 = vector.shape_cast %25 : vector<128xf32> to vector<1x128xf32>
    %cst_9 = arith.constant 1.280000e+02 : f32
    %27 = vector.broadcast %cst_9 : f32 to vector<1x128xf32>
    %28 = arith.divf %26, %27 : vector<1x128xf32>
    %cst_10 = arith.constant 9.99999974E-6 : f32
    %29 = vector.broadcast %cst_10 : f32 to vector<1x128xf32>
    %30 = arith.addf %28, %29 : vector<1x128xf32>
    %31 = math.rsqrt %30 : vector<1x128xf32>
    %32 = vector.broadcast %31 : vector<1x128xf32> to vector<128x128xf32>
    %33 = arith.mulf %23, %32 : vector<128x128xf32>
    %c73 = arith.constant 73 : index
    %c0_11 = arith.constant 0 : index
    %34 = vector.load %arg2[%c73, %c0_11] : memref<80x128xf32, #tpu.memory_space<vmem>>, vector<1x128xf32>
    %35 = vector.broadcast %34 : vector<1x128xf32> to vector<128x128xf32>
    %36 = arith.mulf %33, %35 : vector<128x128xf32>
    %c74 = arith.constant 74 : index
    %c0_12 = arith.constant 0 : index
    %37 = vector.load %arg2[%c74, %c0_12] : memref<80x128xf32, #tpu.memory_space<vmem>>, vector<1x128xf32>
    %38 = vector.broadcast %37 : vector<1x128xf32> to vector<128x128xf32>
    %39 = arith.addf %36, %38 : vector<128x128xf32>
    %40 = vector.extract_strided_slice %39 {offsets = [0, 0], sizes = [128, 32], strides = [1, 1]} : vector<128x128xf32> to vector<128x32xf32>
    %c16 = arith.constant 16 : index
    %c0_13 = arith.constant 0 : index
    %41 = vector.load %arg2[%c16, %c0_13] : memref<80x128xf32, #tpu.memory_space<vmem>>, vector<32x128xf32>
    %cst_14 = arith.constant dense<0.000000e+00> : vector<128x128xf32>
    %42 = tpu.matmul %40, %41, %cst_14 {dimension_numbers = #tpu.dot_dimension_numbers<[1], [0], [0], [1], [0, 0, 1, 1], [], []>} : vector<128x32xf32>, vector<32x128xf32>, vector<128x128xf32> -> vector<128x128xf32>
    %c75 = arith.constant 75 : index
    %c0_15 = arith.constant 0 : index
    %43 = vector.load %arg2[%c75, %c0_15] : memref<80x128xf32, #tpu.memory_space<vmem>>, vector<1x128xf32>
    %44 = vector.broadcast %43 : vector<1x128xf32> to vector<128x128xf32>
    %45 = arith.addf %42, %44 : vector<128x128xf32>
    %cst_16 = arith.constant 0.000000e+00 : f32
    %46 = vector.broadcast %cst_16 : f32 to vector<128x128xf32>
    %47 = arith.maximumf %45, %46 : vector<128x128xf32>
    %48 = vector.extract_strided_slice %47 {offsets = [0, 0], sizes = [128, 16], strides = [1, 1]} : vector<128x128xf32> to vector<128x16xf32>
    %c48 = arith.constant 48 : index
    %c0_17 = arith.constant 0 : index
    %49 = vector.load %arg2[%c48, %c0_17] : memref<80x128xf32, #tpu.memory_space<vmem>>, vector<16x128xf32>
    %cst_18 = arith.constant dense<0.000000e+00> : vector<128x128xf32>
    %50 = tpu.matmul %48, %49, %cst_18 {dimension_numbers = #tpu.dot_dimension_numbers<[1], [0], [0], [1], [0, 0, 1, 1], [], []>} : vector<128x16xf32>, vector<16x128xf32>, vector<128x128xf32> -> vector<128x128xf32>
    %c76 = arith.constant 76 : index
    %c0_19 = arith.constant 0 : index
    %51 = vector.load %arg2[%c76, %c0_19] : memref<80x128xf32, #tpu.memory_space<vmem>>, vector<1x128xf32>
    %52 = vector.broadcast %51 : vector<1x128xf32> to vector<128x128xf32>
    %53 = arith.addf %50, %52 : vector<128x128xf32>
    %cst_20 = arith.constant 0.000000e+00 : f32
    %54 = vector.broadcast %cst_20 : f32 to vector<128x128xf32>
    %55 = arith.maximumf %53, %54 : vector<128x128xf32>
    %56 = vector.extract_strided_slice %55 {offsets = [0, 0], sizes = [128, 8], strides = [1, 1]} : vector<128x128xf32> to vector<128x8xf32>
    %c64 = arith.constant 64 : index
    %c0_21 = arith.constant 0 : index
    %57 = vector.load %arg2[%c64, %c0_21] : memref<80x128xf32, #tpu.memory_space<vmem>>, vector<8x128xf32>
    %cst_22 = arith.constant dense<0.000000e+00> : vector<128x128xf32>
    %58 = tpu.matmul %56, %57, %cst_22 {dimension_numbers = #tpu.dot_dimension_numbers<[1], [0], [0], [1], [0, 0, 1, 1], [], []>} : vector<128x8xf32>, vector<8x128xf32>, vector<128x128xf32> -> vector<128x128xf32>
    %c77 = arith.constant 77 : index
    %c0_23 = arith.constant 0 : index
    %59 = vector.load %arg2[%c77, %c0_23] : memref<80x128xf32, #tpu.memory_space<vmem>>, vector<1x128xf32>
    %60 = vector.broadcast %59 : vector<1x128xf32> to vector<128x128xf32>
    %61 = arith.addf %58, %60 : vector<128x128xf32>
    %62 = arith.negf %61 : vector<128x128xf32>
    %63 = math.exp %62 : vector<128x128xf32>
    %cst_24 = arith.constant 1.000000e+00 : f32
    %64 = vector.broadcast %cst_24 : f32 to vector<128x128xf32>
    %65 = arith.addf %64, %63 : vector<128x128xf32>
    %66 = arith.divf %64, %65 : vector<128x128xf32>
    %c0_25 = arith.constant 0 : index
    %c0_26 = arith.constant 0 : index
    %c0_27 = arith.constant 0 : index
    %67 = vector.load %arg3[%c0_25, %c0_26, %c0_27] : memref<1x128x128xf32, #tpu.memory_space<vmem>>, vector<1x128x128xf32>
    %68 = vector.shape_cast %67 : vector<1x128x128xf32> to vector<128x128xf32>
    %69 = vector.shape_cast %66 : vector<128x128xf32> to vector<1x128x128xf32>
    tpu.vector_store %arg3[%c0_25, %c0_26, %c0_27], %69 {strides = array<i32>} : memref<1x128x128xf32, #tpu.memory_space<vmem>>, vector<1x128x128xf32>,
    return
  }
  func.func @transform_0(%arg0: i32) -> (i32, i32, i32) {
    %c0_i32 = arith.constant 0 : i32
    %c0_i32_0 = arith.constant 0 : i32
    %c0_i32_1 = arith.constant 0 : i32
    return %arg0, %c0_i32, %c0_i32_0 : i32, i32, i32
  }
  func.func @transform_1(%arg0: i32) -> (i32, i32) {
    %c0_i32 = arith.constant 0 : i32
    %c0_i32_0 = arith.constant 0 : i32
    %c0_i32_1 = arith.constant 0 : i32
    return %c0_i32, %c0_i32_0 : i32, i32
  }
  func.func @transform_2(%arg0: i32) -> (i32, i32, i32) {
    %c0_i32 = arith.constant 0 : i32
    %c0_i32_0 = arith.constant 0 : i32
    %c0_i32_1 = arith.constant 0 : i32
    return %arg0, %c0_i32, %c0_i32_0 : i32, i32, i32
  }
}

</mosaic_0001>

<bundles_post_ra>
// kernel: tpu_custom_call.1
= control target key start
LH: loop header
LB: loop body
LE: loop exit
PB: predicated region body
PF: predicated region fallthrough
CT: control target
= control target key end

     0   :  { %7 = vsyncpa [#allocation3], 0  ;;  %s2654_s0 = inlined_call_operand.vmem [shape: f32[2,128,16], index: 0, kind: input, shape index: {}]   ;;  %s2655_s1 = inlined_call_operand.vmem [shape: f32[80,128], index: 1, kind: input, shape index: {}]   ;;  %s2656_s2 = inlined_call_operand.hbm [shape: f32[2,128,128], index: 2, kind: output, shape index: {}]  }
   0x1   :  { %9 = vsyncpa [#allocation3 + $0x1], 0  ;;  %s2183_s9 = smov 0   ;;  %s2185_s10 = smov 0  }
   0x2   :  { %s2187_s11 = smov 0   ;;  %s2189_s12 = smov 0  }
   0x3 LB: > { %s2204_s13 = sadd.s32 4294967295, %s2161_s12   ;;  %s1543_s14 = sadd.s32 4294967294, %s2161_s12   ;;  %s2161_s12 = sphi %s2189_s12, %s2662_s12   ;;  %s2157_s11 = sphi %s2187_s11, %s2661_s11   ;;  %s2153_s10 = sphi %s2185_s10, %s2660_s10   ;;  %s2149_s9 = sphi %s2183_s9, %s2659_s9  }
   0x4   : > { %s2208_s15 = sadd.s32 1, %s2161_s12   ;;  %s69_s16 = sadd.s32 1, %s2157_s11 }
   0x5   : > { %s66_s17 = ssub.s32 %s2161_s12, %s2208_s15  ;;  %p79_p0 = scmp.ne.s32.totalorder %s2157_s11, %s2153_s10 }
   0x6   : > { %p67_p1 = scmp.eq.s32.totalorder %s66_s17, 0  ;;  %p80_p2 = scmp.eq.s32.totalorder %s2204_s13, 1 }
   0x7   : > { %p85_p3 = scmp.ne.s32.totalorder %s2153_s10, %s2149_s9  ;;  %p86_p4 = scmp.eq.s32.totalorder %s1543_s14, 1 }
   0x8   : > { %s2219_s18 = scalar_select %p67_p1, %s2157_s11, %s69_s16  }
   0x9   : > { %p2221_p5 = por %p80_p2, %p79_p0  ;;  %p2225_p6 = por %p86_p4, %p85_p3 }
   0xa   : > { %p1546_p7 = scmp.ge.s32.totalorder %s2161_s12, 1  ;;  %p115_p8 = scmp.lt.s32.totalorder %s2161_s12, 3 }
   0xc   : > { %p116_p9 = pnand %p1546_p7, %p115_p8 }
   0xd   : > { %v158_v0 = vld [vmem:[%s2655_s1] sm:$0xff] (!%p116_p9)  ;;  %v159_v1 = vld [vmem:[%s2655_s1 + $0x8] sm:$0xff] (!%p116_p9)  ;;  %p137_p10 = scmp.lt.s32.totalorder (!%p116_p9), %s2204_s13, 1  ;;  %vm165_vm0 = vcmask (!%p116_p9), 130048   ;;  %s2163_s4 = smov (!%p116_p9), 96   ;;  %vm729_vm1 = vcmask (!%p116_p9), 261120  }
   0xe   : > { %119 = sbr.rel (%p116_p9) target bundleno = 1239 (0x4d7), region = 28  ;;  %v1846_v2 = vpack.c.bf16 (!%p116_p9), %v159_v1, %v158_v0  ;;  %v2279_v19 = vld [vmem:[%s2655_s1 + $0x48] ss:$0 sm:$0xff] (!%p116_p9)  ;;  %s2164_s5 = smov (!%p116_p9), 64   ;;  %vm1161_vm2 = vcmask (!%p116_p9), 64512  }
   0xf   : > { %s134_s17 = sand.u32 (!%p116_p9), 1, %s2153_s10   ;;  %s1658_s23 = sshll.u32 (!%p116_p9), %s2204_s13, 11 }
  0x10   : > { %1847 = vmatprep.subr.bf16.mxu0 (!%p116_p9), %v1846_v2  ;;  %s1547_s21 = sshll.u32 (!%p116_p9), %s134_s17, 7  ;;  %s2605_s27 = scalar_lea.hbm (!%p116_p9), %s2656_s2, %s1658_s23 }
  0x11   : > { %1849 = vmatpush3.bf16.msra.mxu0 (!%p116_p9), %v1846_v2  ;;  %s2582_s22 = scalar_lea.vmem (!%p116_p9), [#allocation2], %s1547_s21  ;;  %s2613_s28 = scalar_lea.sflag (!%p116_p9), [#allocation3], %s134_s17 }
  0x12   : > { %s1481_s24 = sshll.u32 (!%p116_p9), %s2582_s22, 4  ;;  %s2607_s24 = int_to_ptr.vmem [resolvable:$true] %s1481_s24 }
  0x15   : > { %s138_s25 = scalar_select %p137_p10, %s2204_s13, 1 }
  0x16   : > { %s2099_s13 = scalar_lea.vmem %s2607_s24, 2048 }
  0x17   : > { %s1657_s26 = sshll.u32 %s138_s25, 7  ;;  %p2100_p11 = scmp.ne.s32.totalorder %s2607_s24, %s2099_s13 }
  0x18   : > { %s2242_s29 = scalar_lea.vmem %s2654_s0, %s1657_s26 }
  0x19   : > { %v142_v3 = vld [vmem:[%s2242_s29] sm:$0xff]  ;;  %v143_v4 = vld [vmem:[%s2242_s29 + $0x8] sm:$0xff]  ;;  %v144_v5 = vld [vmem:[%s2242_s29 + $0x10] sm:$0xff]  ;;  %p2101_p12 = pnand %p2100_p11, %p2221_p5 }
  0x1a   : > { %1736 = vmatprep.mubr.msk.f32.mxu0 %vm165_vm0, %v142_v3  ;;  %v145_v6 = vld [vmem:[%s2242_s29 + $0x18] sm:$0xff]  ;;  %v146_v7 = vld [vmem:[%s2242_s29 + $0x20] sm:$0xff]  ;;  %v147_v8 = vld [vmem:[%s2242_s29 + $0x28] sm:$0xff] }
  0x1b   : > { %1737 = vmatmul.mubr.msk.f32.vlgmr.msra.gmra.mrb[0].mxu0 %vm165_vm0, %v143_v4  ;;  %v148_v9 = vld [vmem:[%s2242_s29 + $0x30] sm:$0xff]  ;;  %v149_v10 = vld [vmem:[%s2242_s29 + $0x38] sm:$0xff]  ;;  %v150_v11 = vld [vmem:[%s2242_s29 + $0x40] sm:$0xff]  ;;  %p2102_p13 = pneg %p2101_p12 }
  0x1c   : > { %1739 = vmatprep.mubr.msk.f32.mxu0 %vm165_vm0, %v144_v5  ;;  %v151_v12 = vld [vmem:[%s2242_s29 + $0x48] sm:$0xff]  ;;  %v152_v13 = vld [vmem:[%s2242_s29 + $0x50] sm:$0xff]  ;;  %v153_v14 = vld [vmem:[%s2242_s29 + $0x58] sm:$0xff] }
  0x1d   : > { %v154_v15 = vld [vmem:[%s2242_s29 + $0x60] sm:$0xff]  ;;  %v155_v16 = vld [vmem:[%s2242_s29 + $0x68] sm:$0xff]  ;;  %v156_v17 = vld [vmem:[%s2242_s29 + $0x70] sm:$0xff] }
  0x1e   : > { %v157_v18 = vld [vmem:[%s2242_s29 + $0x78] sm:$0xff]  ;;  %s2165_s29 = smov [#allocation2]  }
  0x1f   : > { %1740 = vmatmul.mubr.msk.f32.gmra.mrb[2].mxu0 %vm165_vm0, %v145_v6  ;;  %s2103_s30 = sshll.u32 %s2165_s29, 4  ;;  %s2104_s30 = int_to_ptr.vmem [resolvable:$false] %s2103_s30 }
  0x20   : > { %1742 = vmatprep.mubr.msk.f32.mxu0 %vm165_vm0, %v146_v7  ;;  %s2105_s3 = scalar_lea.vmem %s2104_s30, 4096  ;;  %p2106_p0 = scmp.lt.s32.totalorder %s2607_s24, %s2104_s30 }
  0x21   : > { %p2107_p1 = scmp.lt.s32.totalorder %s2105_s3, %s2099_s13 }
  0x23   : > { %1743 = vmatmul.mubr.msk.f32.gmra.mrb[4].mxu0 %vm165_vm0, %v147_v8  ;;  %p2108_p2 = por %p2107_p1, %p2106_p0 }
  0x24   : > { %1745 = vmatprep.mubr.msk.f32.mxu0 %vm165_vm0, %v148_v9 }
  0x25   : > { %p2109_p3 = pnand %p2108_p2, %p2102_p13 }
  0x27   : > { %1746 = vmatmul.mubr.msk.f32.gmra.mrb[6].mxu0 %vm165_vm0, %v149_v10 }
  0x28   : > { %1748 = vmatprep.mubr.msk.f32.mxu0 %vm165_vm0, %v150_v11 }
  0x2b   : > { %1749 = vmatmul.mubr.msk.f32.gmra.mrb[8].mxu0 %vm165_vm0, %v151_v12 }
  0x2c   : > { %1751 = vmatprep.mubr.msk.f32.mxu0 %vm165_vm0, %v152_v13 }
  0x2f   : > { %1752 = vmatmul.mubr.msk.f32.gmra.mrb[10].mxu0 %vm165_vm0, %v153_v14 }
  0x30   : > { %1754 = vmatprep.mubr.msk.f32.mxu0 %vm165_vm0, %v154_v15 }
  0x33   : > { %1755 = vmatmul.mubr.msk.f32.gmra.mrb[12].mxu0 %vm165_vm0, %v155_v16 }
  0x34   : > { %1757 = vmatprep.mubr.msk.f32.mxu0 %vm165_vm0, %v156_v17 }
  0x37   : > { %1758 = vmatmul.mubr.msk.f32.gmra.mrb[14].mxu0 %vm165_vm0, %v157_v18 }
  0xee   : > { %v1738_v20 = vpop.f32.mrb[0].mxu0 }
  0xef   : > { %v286_v21 = vadd.f32 %v1738_v20, %v2279_v19  ;;  %v280_v22 = vpop.f32.mrb[1].mxu0 }
  0xf0   : > { %v281_v23 = vadd.f32 %v2279_v19, %v280_v22 }
  0xf1   : > { %v1568_v24 = vmul.f32 -1.442695, %v286_v21  ;;  %1905 = vtanh.f32 %v286_v21 }
  0xf2   : > { %v1567_v25 = vmul.f32 -1.442695, %v281_v23  ;;  %1907 = vtanh.f32 %v281_v23  ;;  %v1741_v26 = vpop.f32.mrb[2].mxu0 }
  0xf3   : > { %1909 = vpow2.f32 %v1568_v24  ;;  %v296_v27 = vadd.f32 %v1741_v26, %v2279_v19  ;;  %v290_v28 = vpop.f32.mrb[3].mxu0 }
  0xf4   : > { %1911 = vpow2.f32 %v1567_v25  ;;  %v291_v29 = vadd.f32 %v2279_v19, %v290_v28 }
  0xf5   : > { %v1570_v30 = vmul.f32 -1.442695, %v296_v27  ;;  %1913 = vtanh.f32 %v296_v27 }
  0xf6   : > { %v1744_v31 = vpop.f32.mrb[4].mxu0  ;;  %v1569_v32 = vmul.f32 -1.442695, %v291_v29 }
  0xf7   : > { %v306_v33 = vadd.f32 %v1744_v31, %v2279_v19  ;;  %v300_v34 = vpop.f32.mrb[5].mxu0  ;;  %1915 = vpow2.f32 %v1570_v30 }
  0xf8   : > { %v301_v35 = vadd.f32 %v2279_v19, %v300_v34  ;;  %1917 = vtanh.f32 %v291_v29 }
  0xf9   : > { %v1572_v38 = vmul.f32 -1.442695, %v306_v33 }
  0xfa   : > { %1919 = vtanh.f32 %v301_v35  ;;  %v1747_v36 = vpop.f32.mrb[6].mxu0  ;;  %v1571_v45 = vmul.f32 -1.442695, %v301_v35 }
  0xfb   : > { %v1906_v37 = vpop.eup %1905  ;;  %1921 = vpow2.f32 %v1569_v32  ;;  %v310_v39 = vpop.f32.mrb[7].mxu0  ;;  %v316_v41 = vadd.f32 %v1747_v36, %v2279_v19 }
  0xfc   : > { %v1908_v40 = vpop.eup %1907  ;;  %v311_v42 = vadd.f32 %v2279_v19, %v310_v39  ;;  %473 = vrot.lane.b32.xlu0 %v1906_v37, %s2163_s4  ;;  %1923 = vtanh.f32 %v306_v33 }
  0xfd   : > { %v1910_v43 = vpop.eup %1909  ;;  %v1574_v50 = vmul.f32 -1.442695, %v316_v41 }
  0xfe   : > { %v1912_v44 = vpop.eup %1911  ;;  %1925 = vtanh.f32 %v311_v42  ;;  %v1750_v46 = vpop.f32.mrb[8].mxu0  ;;  %v408_v51 = vadd.f32 1.0, %v1910_v43  ;;  %v1573_v63 = vmul.f32 -1.442695, %v311_v42 }
  0xff   : > { %v1914_v47 = vpop.eup %1913  ;;  %v407_v48 = vadd.f32 1.0, %v1912_v44  ;;  %1927 = vpow2.f32 %v1572_v38  ;;  %v320_v49 = vpop.f32.mrb[9].mxu0  ;;  %v326_v53 = vadd.f32 %v1750_v46, %v2279_v19 }
 0x100   : > { %1929 = vtanh.f32 %v316_v41  ;;  %477 = vrot.lane.b32.xlu1 %v1914_v47, %s2163_s4  ;;  %471 = vrot.lane.b32.xlu0 %v1908_v40, %s2163_s4  ;;  %v321_v60 = vadd.f32 %v2279_v19, %v320_v49 }
 0x101   : > { %1931 = vrcp.f32 %v407_v48  ;;  %v1916_v52 = vpop.eup %1915  ;;  %v1576_v8 = vmul.f32 -1.442695, %v326_v53 }
 0x102   : > { %1933 = vpow2.f32 %v1571_v45  ;;  %v1753_v54 = vpop.f32.mrb[10].mxu0  ;;  %v1918_v55 = vpop.eup %1917  ;;  %v410_v59 = vadd.f32 1.0, %v1916_v52  ;;  %v1575_v11 = vmul.f32 -1.442695, %v321_v60 }
 0x103   : > { %v330_v56 = vpop.f32.mrb[11].mxu0  ;;  %1935 = vpow2.f32 %v1574_v50  ;;  %v336_v4 = vadd.f32 %v1753_v54, %v2279_v19 }
 0x104   : > { %v1920_v57 = vpop.eup %1919  ;;  %475 = vrot.lane.b32.xlu1 %v1918_v55, %s2163_s4  ;;  %1937 = vrcp.f32 %v408_v51  ;;  %v331_v13 = vadd.f32 %v2279_v19, %v330_v56 }
 0x105   : > { %v1922_v58 = vpop.eup %1921  ;;  %479 = vrot.lane.b32.xlu0 %v1920_v57, %s2163_s4  ;;  %1939 = vtanh.f32 %v326_v53  ;;  %v1578_v22 = vmul.f32 -1.442695, %v336_v4 }
 0x106   : > { %v1756_v61 = vpop.f32.mrb[12].mxu0  ;;  %v1924_v62 = vpop.eup %1923  ;;  %v409_v2 = vadd.f32 1.0, %v1922_v58  ;;  %1941 = vrcp.f32 %v410_v59  ;;  %v1577_v20 = vmul.f32 -1.442695, %v331_v13 }
 0x107   : > { %v340_v0 = vpop.f32.mrb[13].mxu0  ;;  %1943 = vtanh.f32 %v321_v60  ;;  %v346_v18 = vadd.f32 %v1756_v61, %v2279_v19 }
 0x108   : > { %v1926_v1 = vpop.eup %1925  ;;  %481 = vrot.lane.b32.xlu1 %v1924_v62, %s2163_s4  ;;  %1945 = vpow2.f32 %v1573_v63  ;;  %v341_v21 = vadd.f32 %v2279_v19, %v340_v0 }
 0x109   : > { %v1928_v3 = vpop.eup %1927  ;;  %483 = vrot.lane.b32.xlu0 %v1926_v1, %s2163_s4  ;;  %1947 = vrcp.f32 %v409_v2  ;;  %v1580_v27 = vmul.f32 -1.442695, %v346_v18 }
 0x10a   : > { %v1930_v5 = vpop.eup %1929  ;;  %v1759_v6 = vpop.f32.mrb[14].mxu0  ;;  %v412_v12 = vadd.f32 1.0, %v1928_v3  ;;  %1949 = vtanh.f32 %v336_v4  ;;  %v1579_v29 = vmul.f32 -1.442695, %v341_v21 }
 0x10b   : > { %v2299_v7 = vpop.eup %1931  ;;  %v350_v9 = vpop.f32.mrb[15].mxu0  ;;  %1951 = vpow2.f32 %v1576_v8  ;;  %v356_v33 = vadd.f32 %v1759_v6, %v2279_v19 }
 0x10c   : > { %v1934_v10 = vpop.eup %1933  ;;  %485 = vrot.lane.b32.xlu1 %v1930_v5, %s2163_s4  ;;  %1953 = vpow2.f32 %v1575_v11  ;;  %v351_v25 = vadd.f32 %v2279_v19, %v350_v9 }
 0x10d   : > { %503 = vrot.lane.b32.xlu0 %v2299_v7, %s2164_s5  ;;  %v1936_v14 = vpop.eup %1935  ;;  %v411_v16 = vadd.f32 1.0, %v1934_v10  ;;  %1955 = vrcp.f32 %v412_v12  ;;  %v1582_v39 = vmul.f32 -1.442695, %v356_v33 }
 0x10e   : > { %v2305_v15 = vpop.eup %1937  ;;  %1957 = vtanh.f32 %v331_v13  ;;  %v414_v24 = vadd.f32 1.0, %v1936_v14  ;;  %v1581_v32 = vmul.f32 -1.442695, %v351_v25 }
 0x10f   : > { %v1940_v17 = vpop.eup %1939  ;;  %1959 = vrcp.f32 %v411_v16 }
 0x110   : > { %505 = vrot.lane.b32.xlu1 %v2305_v15, %s2164_s5  ;;  %v2312_v23 = vpop.eup %1941  ;;  %1961 = vtanh.f32 %v346_v18  ;;  %v720_v18 = vld [vmem:[%s2655_s1 + $0x10] sm:$0xff] }
 0x111   : > { %489 = vrot.lane.b32.xlu0 %v1940_v17, %s2163_s4  ;;  %v1944_v26 = vpop.eup %1943  ;;  %1963 = vpow2.f32 %v1577_v20  ;;  %v721_v20 = vld [vmem:[%s2655_s1 + $0x18] sm:$0xff] }
 0x112   : > { %v1946_v28 = vpop.eup %1945  ;;  %1965 = vpow2.f32 %v1578_v22 }
 0x113   : > { %v2318_v30 = vpop.eup %1947  ;;  %1967 = vrcp.f32 %v414_v24  ;;  %v413_v35 = vadd.f32 1.0, %v1946_v28  ;;  %v722_v24 = vld [vmem:[%s2655_s1 + $0x20] sm:$0xff] }
 0x114   : > { %509 = vrot.lane.b32.xlu1 %v2312_v23, %s2164_s5  ;;  %v1950_v31 = vpop.eup %1949  ;;  %1969 = vpow2.f32 %v1580_v27 }
 0x115   : > { %487 = vrot.lane.b32.xlu0 %v1944_v26, %s2163_s4  ;;  %v1952_v34 = vpop.eup %1951  ;;  %1971 = vpow2.f32 %v1579_v29 }
 0x116   : > { %v1954_v36 = vpop.eup %1953  ;;  %1973 = vtanh.f32 %v341_v21  ;;  %v416_v45 = vadd.f32 1.0, %v1952_v34  ;;  %v1850_v21 = vpack.c.bf16 %v721_v20, %v720_v18 }
 0x117   : > { %v2324_v37 = vpop.eup %1955  ;;  %1975 = vpow2.f32 %v1581_v32  ;;  %v415_v19 = vadd.f32 1.0, %v1954_v36 }
 0x118   : > { %507 = vrot.lane.b32.xlu1 %v2318_v30, %s2164_s5  ;;  %v1958_v38 = vpop.eup %1957  ;;  %1977 = vtanh.f32 %v351_v25  ;;  %1851 = vmatprep.subr.bf16.mxu1 %v1850_v21  ;;  %v723_v25 = vld [vmem:[%s2655_s1 + $0x28] sm:$0xff] }
 0x119   : > { %493 = vrot.lane.b32.xlu0 %v1950_v31, %s2163_s4  ;;  %v2328_v40 = vpop.eup %1959  ;;  %1979 = vrcp.f32 %v413_v35  ;;  %1853 = vmatpush3.bf16.msra.mxu1 %v1850_v21  ;;  %v1854_v27 = vpack.c.bf16 %v723_v25, %v722_v24  ;;  %v940_v24 = vld [vmem:[%s2655_s1 + $0x38] sm:$0xff] }
 0x11a   : > { %v1962_v41 = vpop.eup %1961  ;;  %1981 = vpow2.f32 %v1582_v39 }
 0x11b   : > { %v1964_v42 = vpop.eup %1963  ;;  %1983 = vrcp.f32 %v415_v19  ;;  %1855 = vmatprep.subr.bf16.mxu1 %v1854_v27 }
 0x11c   : > { %513 = vrot.lane.b32.xlu1 %v2324_v37, %s2164_s5  ;;  %v1966_v43 = vpop.eup %1965  ;;  %v417_v47 = vadd.f32 1.0, %v1964_v42  ;;  %1985 = vtanh.f32 %v356_v33 }
 0x11d   : > { %491 = vrot.lane.b32.xlu0 %v1958_v38, %s2163_s4  ;;  %v2333_v44 = vpop.eup %1967  ;;  %1987 = vrcp.f32 %v416_v45  ;;  %v418_v51 = vadd.f32 1.0, %v1966_v43  ;;  %1857 = vmatpush3.bf16.msra.mxu1 %v1854_v27 }
 0x11e   : > { %v1970_v46 = vpop.eup %1969  ;;  %1989 = vrcp.f32 %v417_v47 }
 0x11f   : > { %v1972_v48 = vpop.eup %1971  ;;  %1991 = vrcp.f32 %v418_v51  ;;  %v420_v56 = vadd.f32 1.0, %v1970_v46 }
 0x120   : > { %511 = vrot.lane.b32.xlu1 %v2328_v40, %s2164_s5  ;;  %v1974_v49 = vpop.eup %1973  ;;  %v419_v53 = vadd.f32 1.0, %v1972_v48 }
 0x121   : > { %497 = vrot.lane.b32.xlu0 %v1962_v41, %s2163_s4  ;;  %v1976_v50 = vpop.eup %1975 }
 0x122   : > { %v1978_v52 = vpop.eup %1977  ;;  %v421_v55 = vadd.f32 1.0, %v1976_v50  ;;  %1993 = vrcp.f32 %v419_v53 }
 0x123   : > { %v2339_v54 = vpop.eup %1979 }
 0x124   : > { %517 = vrot.lane.b32.xlu1 %v2333_v44, %s2164_s5  ;;  %v1982_v57 = vpop.eup %1981  ;;  %1995 = vrcp.f32 %v421_v55 }
 0x125   : > { %495 = vrot.lane.b32.xlu0 %v1974_v49, %s2163_s4  ;;  %v2344_v58 = vpop.eup %1983  ;;  %1997 = vrcp.f32 %v420_v56  ;;  %v422_v60 = vadd.f32 1.0, %v1982_v57 }
 0x126   : > { %v1986_v59 = vpop.eup %1985 }
 0x127   : > { %v2349_v61 = vpop.eup %1987  ;;  %1999 = vrcp.f32 %v422_v60 }
 0x128   : > { %515 = vrot.lane.b32.xlu1 %v2339_v54, %s2164_s5  ;;  %v2351_v62 = vpop.eup %1989 }
 0x129   : > { %499 = vrot.lane.b32.xlu0 %v1978_v52, %s2163_s4  ;;  %v2357_v63 = vpop.eup %1991 }
 0x12c   : > { %519 = vrot.lane.b32.xlu1 %v2344_v58, %s2164_s5  ;;  %v2359_v0 = vpop.eup %1993 }
 0x12d   : > { %501 = vrot.lane.b32.xlu0 %v1986_v59, %s2163_s4 }
 0x12e   : > { %v2365_v1 = vpop.eup %1995 }
 0x12f   : > { %v2367_v2 = vpop.eup %1997 }
 0x130   : > { %521 = vrot.lane.b32.xlu1 %v2349_v61, %s2164_s5 }
 0x131   : > { %523 = vrot.lane.b32.xlu0 %v2351_v62, %s2164_s5  ;;  %v2373_v3 = vpop.eup %1999 }
 0x134   : > { %525 = vrot.lane.b32.xlu1 %v2357_v63, %s2164_s5 }
 0x135   : > { %527 = vrot.lane.b32.xlu0 %v2359_v0, %s2164_s5 }
 0x138   : > { %529 = vrot.lane.b32.xlu1 %v2367_v2, %s2164_s5 }
 0x139   : > { %531 = vrot.lane.b32.xlu0 %v2365_v1, %s2164_s5 }
 0x13c   : > { %533 = vrot.lane.b32.xlu1 %v2373_v3, %s2164_s5 }
 0x16e   : > { %v474_v4 = vpop.permute.xlu0 %473 }
 0x16f   : > { %v536_v11 = vmul.f32 %v2305_v15, %v474_v4 }
 0x171   : > { %2001 = vtanh.f32 %v536_v11 }
 0x172   : > { %v478_v5 = vpop.permute.xlu1 %477  ;;  %v472_v6 = vpop.permute.xlu0 %471 }
 0x173   : > { %v535_v13 = vmul.f32 %v2299_v7, %v472_v6  ;;  %v538_v7 = vmul.f32 %v2312_v23, %v478_v5 }
 0x175   : > { %2003 = vtanh.f32 %v535_v13 }
 0x176   : > { %v476_v8 = vpop.permute.xlu1 %475 }
 0x177   : > { %v480_v9 = vpop.permute.xlu0 %479  ;;  %v537_v14 = vmul.f32 %v2318_v30, %v476_v8 }
 0x178   : > { %v539_v26 = vmul.f32 %v2328_v40, %v480_v9 }
 0x179   : > { %2005 = vtanh.f32 %v537_v14 }
 0x17a   : > { %v482_v10 = vpop.permute.xlu1 %481  ;;  %2007 = vtanh.f32 %v538_v7 }
 0x17b   : > { %v484_v12 = vpop.permute.xlu0 %483  ;;  %2009 = vtanh.f32 %v539_v26  ;;  %v2002_v23 = vpop.eup %2001  ;;  %v540_v31 = vmul.f32 %v2324_v37, %v482_v10 }
 0x17c   : > { %v541_v36 = vmul.f32 %v2339_v54, %v484_v12 }
 0x17d   : > { %2011 = vtanh.f32 %v540_v31 }
 0x17e   : > { %v486_v16 = vpop.permute.xlu1 %485  ;;  %2013 = vtanh.f32 %v541_v36 }
 0x17f   : > { %v504_v17 = vpop.permute.xlu0 %503  ;;  %v2004_v30 = vpop.eup %2003  ;;  %v542_v40 = vmul.f32 %v2333_v44, %v486_v16 }
 0x180   : > { %v2398_v38 = vmul.f32 %v2004_v30, %v504_v17 }
 0x181   : > { %2015 = vtanh.f32 %v542_v40 }
 0x182   : > { %v506_v15 = vpop.permute.xlu1 %505 }
 0x183   : > { %v490_v22 = vpop.permute.xlu0 %489  ;;  %v2395_v33 = vmul.f32 %v2002_v23, %v506_v15  ;;  %v2006_v35 = vpop.eup %2005 }
 0x184   : > { %v2008_v43 = vpop.eup %2007  ;;  %v544_v44 = vmul.f32 %v2349_v61, %v490_v22  ;;  %v939_v22 = vld [vmem:[%s2655_s1 + $0x30] sm:$0xff] }
 0x185   : > { %v583_v41 = vadd.f32 %v2395_v33, %v2398_v38  ;;  %v2010_v46 = vpop.eup %2009  ;;  %v1858_v26 = vpack.c.bf16 %v940_v24, %v939_v22 }
 0x186   : > { %v510_v28 = vpop.permute.xlu1 %509 }
 0x187   : > { %v488_v29 = vpop.permute.xlu0 %487  ;;  %v2407_v48 = vmul.f32 %v2008_v43, %v510_v28  ;;  %v2012_v56 = vpop.eup %2011  ;;  %1859 = vmatprep.subr.bf16.mxu0 %v1858_v26 }
 0x188   : > { %v543_v37 = vmul.f32 %v2344_v58, %v488_v29  ;;  %v2014_v60 = vpop.eup %2013  ;;  %1861 = vmatpush3.bf16.msra.mxu0 %v1858_v26 }
 0x18a   : > { %v508_v32 = vpop.permute.xlu1 %507  ;;  %2017 = vtanh.f32 %v543_v37 }
 0x18b   : > { %v494_v34 = vpop.permute.xlu0 %493  ;;  %v2400_v39 = vmul.f32 %v2006_v35, %v508_v32  ;;  %2019 = vtanh.f32 %v544_v44  ;;  %v2016_v6 = vpop.eup %2015 }
 0x18c   : > { %v546_v57 = vmul.f32 %v2357_v63, %v494_v34 }
 0x18d   : > { %v584_v45 = vadd.f32 %v583_v41, %v2400_v39 }
 0x18e   : > { %v514_v19 = vpop.permute.xlu1 %513 }
 0x18f   : > { %v492_v42 = vpop.permute.xlu0 %491  ;;  %v585_v52 = vadd.f32 %v584_v45, %v2407_v48  ;;  %v2416_v58 = vmul.f32 %v2012_v56, %v514_v19 }
 0x190   : > { %v545_v51 = vmul.f32 %v2351_v62, %v492_v42 }
 0x192   : > { %v512_v47 = vpop.permute.xlu1 %511  ;;  %2021 = vtanh.f32 %v545_v51 }
 0x193   : > { %v2409_v49 = vmul.f32 %v2010_v46, %v512_v47  ;;  %v498_v50 = vpop.permute.xlu0 %497  ;;  %2023 = vtanh.f32 %v546_v57 }
 0x194   : > { %v548_v8 = vmul.f32 %v2367_v2, %v498_v50  ;;  %v2018_v11 = vpop.eup %2017 }
 0x195   : > { %v586_v54 = vadd.f32 %v585_v52, %v2409_v49  ;;  %v2020_v17 = vpop.eup %2019 }
 0x196   : > { %v518_v53 = vpop.permute.xlu1 %517 }
 0x197   : > { %v496_v55 = vpop.permute.xlu0 %495  ;;  %v587_v62 = vadd.f32 %v586_v54, %v2416_v58  ;;  %v2423_v9 = vmul.f32 %v2016_v6, %v518_v53 }
 0x198   : > { %v547_v59 = vmul.f32 %v2359_v0, %v496_v55 }
 0x19a   : > { %v516_v61 = vpop.permute.xlu1 %515  ;;  %2025 = vtanh.f32 %v547_v59 }
 0x19b   : > { %v2419_v4 = vmul.f32 %v2014_v60, %v516_v61  ;;  %v500_v5 = vpop.permute.xlu0 %499  ;;  %2027 = vtanh.f32 %v548_v8 }
 0x19c   : > { %v549_v10 = vmul.f32 %v2365_v1, %v500_v5  ;;  %v2022_v18 = vpop.eup %2021 }
 0x19d   : > { %v588_v63 = vadd.f32 %v587_v62, %v2419_v4 }
 0x19e   : > { %v520_v0 = vpop.permute.xlu1 %519  ;;  %2029 = vtanh.f32 %v549_v10 }
 0x19f   : > { %v2427_v12 = vmul.f32 %v2018_v11, %v520_v0  ;;  %v589_v13 = vadd.f32 %v588_v63, %v2423_v9  ;;  %v502_v14 = vpop.permute.xlu0 %501 }
 0x1a0   : > { %v550_v16 = vmul.f32 %v2373_v3, %v502_v14  ;;  %v2024_v3 = vpop.eup %2023 }
 0x1a1   : > { %v590_v20 = vadd.f32 %v589_v13, %v2427_v12 }
 0x1a2   : > { %v522_v2 = vpop.permute.xlu1 %521  ;;  %2031 = vtanh.f32 %v550_v16 }
 0x1a3   : > { %v576_v21 = vmul.f32 %v2020_v17, %v522_v2  ;;  %v524_v15 = vpop.permute.xlu0 %523 }
 0x1a4   : > { %v577_v1 = vmul.f32 %v2022_v18, %v524_v15  ;;  %v2026_v27 = vpop.eup %2025 }
 0x1a5   : > { %v591_v7 = vadd.f32 %v590_v20, %v576_v21  ;;  %v2028_v32 = vpop.eup %2027 }
 0x1a6   : > { %v526_v25 = vpop.permute.xlu1 %525 }
 0x1a7   : > { %v592_v28 = vadd.f32 %v591_v7, %v577_v1  ;;  %v578_v29 = vmul.f32 %v2024_v3, %v526_v25  ;;  %v528_v23 = vpop.permute.xlu0 %527 }
 0x1a8   : > { %v579_v30 = vmul.f32 %v2026_v27, %v528_v23  ;;  %v2030_v35 = vpop.eup %2029 }
 0x1a9   : > { %v593_v31 = vadd.f32 %v592_v28, %v578_v29 }
 0x1aa   : > { %v530_v34 = vpop.permute.xlu1 %529 }
 0x1ab   : > { %v594_v36 = vadd.f32 %v593_v31, %v579_v30  ;;  %v580_v40 = vmul.f32 %v2028_v32, %v530_v34  ;;  %v532_v19 = vpop.permute.xlu0 %531 }
 0x1ac   : > { %v581_v41 = vmul.f32 %v2030_v35, %v532_v19  ;;  %v2032_v37 = vpop.eup %2031 }
 0x1ad   : > { %v595_v42 = vadd.f32 %v594_v36, %v580_v40 }
 0x1ae   : > { %v534_v43 = vpop.permute.xlu1 %533 }
 0x1af   : > { %v596_v45 = vadd.f32 %v595_v42, %v581_v41  ;;  %v582_v46 = vmul.f32 %v2032_v37, %v534_v43 }
 0x1b1   : > { %v597_v47 = vadd.f32 %v596_v45, %v582_v46 }
 0x1b3   : > { %v598_v50 = vrot.slane %v597_v47, 4 }
 0x1b5   : > { %v599_v44 = vadd.f32 %v598_v50, %v597_v47  ;;  %v1583_v47 = vld [vmem:[%s2655_s1 + $0x49] ss:$0 sm:$0xff] }
 0x1b7   : > { %v600_v51 = vrot.slane %v599_v44, 2 }
 0x1b9   : > { %v601_v52 = vadd.f32 %v600_v51, %v599_v44 }
 0x1bb   : > { %v602_v53 = vrot.slane %v601_v52, 1 }
 0x1bd   : > { %v603_v54 = vadd.f32 %v602_v53, %v601_v52  ;;  %v1584_v52 = vld [vmem:[%s2655_s1 + $0x4a] ss:$0 sm:$0xff] }
 0x1bf   : > { %v605_v55 = vmul.f32 0.0078125, %v603_v54 }
 0x1c1   : > { %v606_v56 = vsub.f32 %v2398_v38, %v605_v55  ;;  %v607_v57 = vsub.f32 %v2395_v33, %v605_v55  ;;  %v608_v59 = vsub.f32 %v2400_v39, %v605_v55  ;;  %v609_v62 = vsub.f32 %v2407_v48, %v605_v55 }
 0x1c2   : > { %v610_v5 = vsub.f32 %v2409_v49, %v605_v55  ;;  %v611_v63 = vsub.f32 %v2416_v58, %v605_v55  ;;  %v2445_v0 = vsub.f32 %v2419_v4, %v605_v55  ;;  %v2448_v33 = vsub.f32 %v2423_v9, %v605_v55 }
 0x1c3   : > { %v622_v60 = vmul.f32 %v606_v56, %v606_v56  ;;  %v623_v61 = vmul.f32 %v607_v57, %v607_v57  ;;  %v624_v6 = vmul.f32 %v608_v59, %v608_v59  ;;  %v625_v10 = vmul.f32 %v609_v62, %v609_v62 }
 0x1c4   : > { %v626_v38 = vmul.f32 %v610_v5, %v610_v5  ;;  %v627_v39 = vmul.f32 %v611_v63, %v611_v63  ;;  %v2451_v48 = vsub.f32 %v2427_v12, %v605_v55  ;;  %v628_v49 = vmul.f32 %v2445_v0, %v2445_v0 }
 0x1c5   : > { %v638_v8 = vadd.f32 %v623_v61, %v622_v60  ;;  %v2455_v58 = vsub.f32 %v576_v21, %v605_v55  ;;  %v629_v4 = vmul.f32 %v2448_v33, %v2448_v33  ;;  %v2459_v2 = vsub.f32 %v577_v1, %v605_v55 }
 0x1c6   : > { %v630_v9 = vmul.f32 %v2451_v48, %v2451_v48  ;;  %v2463_v20 = vsub.f32 %v578_v29, %v605_v55  ;;  %v2467_v7 = vsub.f32 %v579_v30, %v605_v55  ;;  %v2471_v24 = vsub.f32 %v580_v40, %v605_v55 }
 0x1c7   : > { %v639_v11 = vadd.f32 %v638_v8, %v624_v6  ;;  %v631_v12 = vmul.f32 %v2455_v58, %v2455_v58  ;;  %v632_v21 = vmul.f32 %v2459_v2, %v2459_v2  ;;  %v2475_v25 = vsub.f32 %v581_v41, %v605_v55 }
 0x1c8   : > { %v633_v1 = vmul.f32 %v2463_v20, %v2463_v20  ;;  %v634_v26 = vmul.f32 %v2467_v7, %v2467_v7  ;;  %v2479_v28 = vsub.f32 %v582_v46, %v605_v55  ;;  %v635_v29 = vmul.f32 %v2471_v24, %v2471_v24 }
 0x1c9   : > { %v640_v13 = vadd.f32 %v639_v11, %v625_v10  ;;  %v636_v30 = vmul.f32 %v2475_v25, %v2475_v25 }
 0x1ca   : > { %v637_v32 = vmul.f32 %v2479_v28, %v2479_v28 }
 0x1cb   : > { %v641_v14 = vadd.f32 %v640_v13, %v626_v38 }
 0x1cd   : > { %v642_v16 = vadd.f32 %v641_v14, %v627_v39 }
 0x1cf   : > { %v643_v17 = vadd.f32 %v642_v16, %v628_v49 }
 0x1d1   : > { %v644_v18 = vadd.f32 %v643_v17, %v629_v4 }
 0x1d3   : > { %v645_v15 = vadd.f32 %v644_v18, %v630_v9 }
 0x1d5   : > { %v646_v22 = vadd.f32 %v645_v15, %v631_v12 }
 0x1d7   : > { %v647_v3 = vadd.f32 %v646_v22, %v632_v21 }
 0x1d9   : > { %v648_v27 = vadd.f32 %v647_v3, %v633_v1 }
 0x1db   : > { %v649_v23 = vadd.f32 %v648_v27, %v634_v26 }
 0x1dd   : > { %v650_v31 = vadd.f32 %v649_v23, %v635_v29 }
 0x1df   : > { %v651_v34 = vadd.f32 %v650_v31, %v636_v30  ;;  %v1585_v31 = vld [vmem:[%s2655_s1 + $0x4b] ss:$0 sm:$0xff] }
 0x1e1   : > { %v652_v35 = vadd.f32 %v651_v34, %v637_v32 }
 0x1e3   : > { %v653_v36 = vrot.slane %v652_v35, 4 }
 0x1e5   : > { %v654_v40 = vadd.f32 %v653_v36, %v652_v35 }
 0x1e7   : > { %v655_v19 = vrot.slane %v654_v40, 2 }
 0x1e9   : > { %v656_v41 = vadd.f32 %v655_v19, %v654_v40 }
 0x1eb   : > { %v657_v42 = vrot.slane %v656_v41, 1 }
 0x1ed   : > { %v658_v37 = vadd.f32 %v657_v42, %v656_v41 }
 0x1ef   : > { %v659_v43 = vmul.f32 0.0078125, %v658_v37 }
 0x1f1   : > { %v660_v45 = vadd.f32 1e-05, %v659_v43 }
 0x1f3   : > { %2033 = vrsqrt.f32 %v660_v45 }
 0x1fd   : > { %v2034_v46 = vpop.eup %2033 }
 0x1fe   : > { %v662_v50 = vmul.f32 %v2034_v46, %v606_v56  ;;  %v663_v44 = vmul.f32 %v2034_v46, %v607_v57  ;;  %v664_v51 = vmul.f32 %v2034_v46, %v608_v59  ;;  %v665_v53 = vmul.f32 %v2034_v46, %v609_v62 }
 0x1ff   : > { %v666_v61 = vmul.f32 %v2034_v46, %v610_v5  ;;  %v667_v11 = vmul.f32 %v2034_v46, %v611_v63  ;;  %v668_v57 = vmul.f32 %v2034_v46, %v2445_v0  ;;  %v669_v13 = vmul.f32 %v2034_v46, %v2448_v33 }
 0x200   : > { %v683_v54 = vmul.f32 %v1583_v47, %v662_v50  ;;  %v684_v55 = vmul.f32 %v1583_v47, %v663_v44  ;;  %v685_v60 = vmul.f32 %v1583_v47, %v664_v51  ;;  %v686_v10 = vmul.f32 %v1583_v47, %v665_v53 }
 0x201   : > { %v687_v56 = vmul.f32 %v1583_v47, %v666_v61  ;;  %v688_v62 = vmul.f32 %v1583_v47, %v667_v11  ;;  %v689_v39 = vmul.f32 %v1583_v47, %v668_v57  ;;  %v670_v14 = vmul.f32 %v2034_v46, %v2451_v48 }
 0x202   : > { %v704_v6 = vadd.f32 %v1584_v52, %v683_v54  ;;  %v705_v8 = vadd.f32 %v1584_v52, %v684_v55  ;;  %v706_v38 = vadd.f32 %v1584_v52, %v685_v60  ;;  %v707_v59 = vadd.f32 %v1584_v52, %v686_v10 }
 0x203   : > { %v708_v5 = vadd.f32 %v1584_v52, %v687_v56  ;;  %v709_v63 = vadd.f32 %v1584_v52, %v688_v62  ;;  %v690_v49 = vmul.f32 %v1583_v47, %v669_v13  ;;  %v671_v0 = vmul.f32 %v2034_v46, %v2455_v58 }
 0x204   : > { %1768 = vmatprep.mubr.msk.f32.mxu1 %vm729_vm1, %v704_v6  ;;  %v710_v16 = vadd.f32 %v1584_v52, %v689_v39  ;;  %v691_v4 = vmul.f32 %v1583_v47, %v670_v14  ;;  %v672_v17 = vmul.f32 %v2034_v46, %v2459_v2  ;;  %v673_v48 = vmul.f32 %v2034_v46, %v2463_v20 }
 0x205   : > { %1769 = vmatmul.mubr.msk.f32.vlgmr.msra.gmra.mrb[0].mxu1 %vm729_vm1, %v705_v8  ;;  %v711_v33 = vadd.f32 %v1584_v52, %v690_v49  ;;  %v692_v9 = vmul.f32 %v1583_v47, %v671_v0  ;;  %v674_v15 = vmul.f32 %v2034_v46, %v2467_v7  ;;  %v675_v2 = vmul.f32 %v2034_v46, %v2471_v24 }
 0x206   : > { %1771 = vmatprep.mubr.msk.f32.mxu1 %vm729_vm1, %v706_v38  ;;  %v712_v18 = vadd.f32 %v1584_v52, %v691_v4  ;;  %v693_v12 = vmul.f32 %v1583_v47, %v672_v17  ;;  %v694_v21 = vmul.f32 %v1583_v47, %v673_v48  ;;  %v676_v3 = vmul.f32 %v2034_v46, %v2475_v25 }
 0x207   : > { %v713_v58 = vadd.f32 %v1584_v52, %v692_v9  ;;  %v695_v1 = vmul.f32 %v1583_v47, %v674_v15  ;;  %v677_v20 = vmul.f32 %v2034_v46, %v2479_v28  ;;  %v696_v7 = vmul.f32 %v1583_v47, %v675_v2  ;;  %v1155_v28 = vld [vmem:[%s2655_s1 + $0x40] sm:$0xff] }
 0x208   : > { %v714_v22 = vadd.f32 %v1584_v52, %v693_v12  ;;  %v715_v26 = vadd.f32 %v1584_v52, %v694_v21  ;;  %v697_v29 = vmul.f32 %v1583_v47, %v676_v3  ;;  %1820 = vmatprep.subr.mxu1 %v1155_v28  ;;  %v1602_v21 = vld [vmem:[%s2655_s1 + $0x4c] ss:$0 sm:$0xff] }
 0x209   : > { %1772 = vmatmul.mubr.msk.f32.gmra.mrb[2].mxu1 %vm729_vm1, %v707_v59  ;;  %v716_v27 = vadd.f32 %v1584_v52, %v695_v1  ;;  %v698_v23 = vmul.f32 %v1583_v47, %v677_v20  ;;  %v717_v24 = vadd.f32 %v1584_v52, %v696_v7 }
 0x20a   : > { %1774 = vmatprep.mubr.msk.f32.mxu1 %vm729_vm1, %v708_v5  ;;  %v718_v30 = vadd.f32 %v1584_v52, %v697_v29  ;;  %1821 = vmatpush3.msra.mxu1 %v1155_v28 }
 0x20b   : > { %v719_v25 = vadd.f32 %v1584_v52, %v698_v23 }
 0x20d   : > { %1775 = vmatmul.mubr.msk.f32.gmra.mrb[4].mxu1 %vm729_vm1, %v709_v63 }
 0x20e   : > { %1777 = vmatprep.mubr.msk.f32.mxu1 %vm729_vm1, %v710_v16 }
 0x211   : > { %1778 = vmatmul.mubr.msk.f32.gmra.mrb[6].mxu1 %vm729_vm1, %v711_v33 }
 0x212   : > { %1780 = vmatprep.mubr.msk.f32.mxu1 %vm729_vm1, %v712_v18 }
 0x215   : > { %1781 = vmatmul.mubr.msk.f32.gmra.mrb[8].mxu1 %vm729_vm1, %v713_v58 }
 0x216   : > { %1783 = vmatprep.mubr.msk.f32.mxu1 %vm729_vm1, %v714_v22 }
 0x219   : > { %1784 = vmatmul.mubr.msk.f32.gmra.mrb[10].mxu1 %vm729_vm1, %v715_v26 }
 0x21a   : > { %1786 = vmatprep.mubr.msk.f32.mxu1 %vm729_vm1, %v716_v27 }
 0x21d   : > { %1787 = vmatmul.mubr.msk.f32.gmra.mrb[12].mxu1 %vm729_vm1, %v717_v24 }
 0x21e   : > { %1789 = vmatprep.mubr.msk.f32.mxu1 %vm729_vm1, %v718_v30 }
 0x221   : > { %1790 = vmatmul.mubr.msk.f32.gmra.mrb[14].mxu1 %vm729_vm1, %v719_v25 }
 0x2d8   : > { %v1770_v32 = vpop.f32.mrb[0].mxu1 }
 0x2d9   : > { %v850_v34 = vadd.f32 %v1770_v32, %v1585_v31  ;;  %v844_v35 = vpop.f32.mrb[1].mxu1 }
 0x2da   : > { %v845_v36 = vadd.f32 %v1585_v31, %v844_v35 }
 0x2db   : > { %v924_v41 = vmax.f32 %v850_v34, 0.0 }
 0x2dc   : > { %v923_v40 = vmax.f32 %v845_v36, 0.0  ;;  %v1773_v19 = vpop.f32.mrb[2].mxu1 }
 0x2dd   : > { %v860_v42 = vadd.f32 %v1773_v19, %v1585_v31  ;;  %v854_v37 = vpop.f32.mrb[3].mxu1 }
 0x2de   : > { %v855_v43 = vadd.f32 %v1585_v31, %v854_v37  ;;  %1796 = vmatprep.mubr.msk.f32.mxu0 %vm165_vm0, %v923_v40 }
 0x2df   : > { %1797 = vmatmul.mubr.msk.f32.vlgmr.msra.gmra.mrb[16].mxu0 %vm165_vm0, %v924_v41  ;;  %v926_v47 = vmax.f32 %v860_v42, 0.0 }
 0x2e0   : > { %v925_v45 = vmax.f32 %v855_v43, 0.0  ;;  %v1776_v46 = vpop.f32.mrb[4].mxu1 }
 0x2e1   : > { %v870_v50 = vadd.f32 %v1776_v46, %v1585_v31  ;;  %v864_v44 = vpop.f32.mrb[5].mxu1 }
 0x2e2   : > { %v865_v51 = vadd.f32 %v1585_v31, %v864_v44  ;;  %1799 = vmatprep.mubr.msk.f32.mxu0 %vm165_vm0, %v925_v45 }
 0x2e3   : > { %1800 = vmatmul.mubr.msk.f32.gmra.mrb[18].mxu0 %vm165_vm0, %v926_v47  ;;  %v928_v54 = vmax.f32 %v870_v50, 0.0 }
 0x2e4   : > { %v927_v52 = vmax.f32 %v865_v51, 0.0  ;;  %v1779_v53 = vpop.f32.mrb[6].mxu1 }
 0x2e5   : > { %v880_v55 = vadd.f32 %v1779_v53, %v1585_v31  ;;  %v874_v60 = vpop.f32.mrb[7].mxu1 }
 0x2e6   : > { %v875_v61 = vadd.f32 %v1585_v31, %v874_v60  ;;  %1802 = vmatprep.mubr.msk.f32.mxu0 %vm165_vm0, %v927_v52 }
 0x2e7   : > { %1803 = vmatmul.mubr.msk.f32.gmra.mrb[20].mxu0 %vm165_vm0, %v928_v54  ;;  %v930_v10 = vmax.f32 %v880_v55, 0.0 }
 0x2e8   : > { %v929_v6 = vmax.f32 %v875_v61, 0.0  ;;  %v1782_v8 = vpop.f32.mrb[8].mxu1 }
 0x2e9   : > { %v890_v11 = vadd.f32 %v1782_v8, %v1585_v31  ;;  %v884_v38 = vpop.f32.mrb[9].mxu1 }
 0x2ea   : > { %v885_v56 = vadd.f32 %v1585_v31, %v884_v38  ;;  %1805 = vmatprep.mubr.msk.f32.mxu0 %vm165_vm0, %v929_v6 }
 0x2eb   : > { %1806 = vmatmul.mubr.msk.f32.gmra.mrb[22].mxu0 %vm165_vm0, %v930_v10  ;;  %v932_v62 = vmax.f32 %v890_v11, 0.0 }
 0x2ec   : > { %v931_v57 = vmax.f32 %v885_v56, 0.0  ;;  %v1785_v59 = vpop.f32.mrb[10].mxu1 }
 0x2ed   : > { %v900_v13 = vadd.f32 %v1785_v59, %v1585_v31  ;;  %v894_v5 = vpop.f32.mrb[11].mxu1 }
 0x2ee   : > { %v895_v39 = vadd.f32 %v1585_v31, %v894_v5  ;;  %1808 = vmatprep.mubr.msk.f32.mxu0 %vm165_vm0, %v931_v57 }
 0x2ef   : > { %1809 = vmatmul.mubr.msk.f32.gmra.mrb[24].mxu0 %vm165_vm0, %v932_v62  ;;  %v934_v49 = vmax.f32 %v900_v13, 0.0 }
 0x2f0   : > { %v933_v14 = vmax.f32 %v895_v39, 0.0  ;;  %v1788_v63 = vpop.f32.mrb[12].mxu1  ;;  %v2563_v39 = vld [vmem:[%s2655_s1 + $0x4d] ss:$0 sm:$0xff] }
 0x2f1   : > { %v910_v0 = vadd.f32 %v1788_v63, %v1585_v31  ;;  %v904_v16 = vpop.f32.mrb[13].mxu1 }
 0x2f2   : > { %v905_v4 = vadd.f32 %v1585_v31, %v904_v16  ;;  %1811 = vmatprep.mubr.msk.f32.mxu0 %vm165_vm0, %v933_v14 }
 0x2f3   : > { %1812 = vmatmul.mubr.msk.f32.gmra.mrb[26].mxu0 %vm165_vm0, %v934_v49  ;;  %v936_v9 = vmax.f32 %v910_v0, 0.0 }
 0x2f4   : > { %v935_v17 = vmax.f32 %v905_v4, 0.0  ;;  %v1791_v33 = vpop.f32.mrb[14].mxu1 }
 0x2f5   : > { %v920_v48 = vadd.f32 %v1791_v33, %v1585_v31  ;;  %v914_v18 = vpop.f32.mrb[15].mxu1 }
 0x2f6   : > { %v915_v12 = vadd.f32 %v1585_v31, %v914_v18  ;;  %1814 = vmatprep.mubr.msk.f32.mxu0 %vm165_vm0, %v935_v17 }
 0x2f7   : > { %1815 = vmatmul.mubr.msk.f32.gmra.mrb[28].mxu0 %vm165_vm0, %v936_v9  ;;  %v938_v58 = vmax.f32 %v920_v48, 0.0 }
 0x2f8   : > { %v937_v15 = vmax.f32 %v915_v12, 0.0 }
 0x2fa   : > { %1817 = vmatprep.mubr.msk.f32.mxu0 %vm165_vm0, %v937_v15 }
 0x2fb   : > { %1818 = vmatmul.mubr.msk.f32.gmra.mrb[30].mxu0 %vm165_vm0, %v938_v58 }
 0x3b2   : > { %v1798_v2 = vpop.f32.mrb[16].mxu0 }
 0x3b3   : > { %v1066_v22 = vadd.f32 %v1798_v2, %v1602_v21  ;;  %v1060_v1 = vpop.f32.mrb[17].mxu0 }
 0x3b4   : > { %v1061_v3 = vadd.f32 %v1602_v21, %v1060_v1 }
 0x3b5   : > { %v1140_v7 = vmax.f32 %v1066_v22, 0.0 }
 0x3b6   : > { %v1139_v20 = vmax.f32 %v1061_v3, 0.0  ;;  %v1801_v26 = vpop.f32.mrb[18].mxu0 }
 0x3b7   : > { %v1076_v27 = vadd.f32 %v1801_v26, %v1602_v21  ;;  %v1070_v29 = vpop.f32.mrb[19].mxu0 }
 0x3b8   : > { %v1071_v23 = vadd.f32 %v1602_v21, %v1070_v29  ;;  %1822 = vmatprep.mubr.msk.f32.mxu1 %vm1161_vm2, %v1139_v20 }
 0x3b9   : > { %1823 = vmatmul.mubr.msk.f32.vlgmr.msra.gmra.mrb[16].mxu1 %vm1161_vm2, %v1140_v7  ;;  %v1142_v25 = vmax.f32 %v1076_v27, 0.0 }
 0x3ba   : > { %v1141_v24 = vmax.f32 %v1071_v23, 0.0  ;;  %v1804_v30 = vpop.f32.mrb[20].mxu0 }
 0x3bb   : > { %v1086_v28 = vadd.f32 %v1804_v30, %v1602_v21  ;;  %v1080_v31 = vpop.f32.mrb[21].mxu0 }
 0x3bc   : > { %v1081_v32 = vadd.f32 %v1602_v21, %v1080_v31  ;;  %1825 = vmatprep.mubr.msk.f32.mxu1 %vm1161_vm2, %v1141_v24 }
 0x3bd   : > { %1826 = vmatmul.mubr.msk.f32.gmra.mrb[18].mxu1 %vm1161_vm2, %v1142_v25  ;;  %v1144_v36 = vmax.f32 %v1086_v28, 0.0 }
 0x3be   : > { %v1143_v34 = vmax.f32 %v1081_v32, 0.0  ;;  %v1807_v35 = vpop.f32.mrb[22].mxu0 }
 0x3bf   : > { %v1096_v40 = vadd.f32 %v1807_v35, %v1602_v21  ;;  %v1090_v19 = vpop.f32.mrb[23].mxu0 }
 0x3c0   : > { %v1091_v41 = vadd.f32 %v1602_v21, %v1090_v19  ;;  %1828 = vmatprep.mubr.msk.f32.mxu1 %vm1161_vm2, %v1143_v34 }
 0x3c1   : > { %1829 = vmatmul.mubr.msk.f32.gmra.mrb[20].mxu1 %vm1161_vm2, %v1144_v36  ;;  %v1146_v43 = vmax.f32 %v1096_v40, 0.0 }
 0x3c2   : > { %v1145_v42 = vmax.f32 %v1091_v41, 0.0  ;;  %v1810_v37 = vpop.f32.mrb[24].mxu0 }
 0x3c3   : > { %v1106_v45 = vadd.f32 %v1810_v37, %v1602_v21  ;;  %v1100_v46 = vpop.f32.mrb[25].mxu0 }
 0x3c4   : > { %v1101_v47 = vadd.f32 %v1602_v21, %v1100_v46  ;;  %1831 = vmatprep.mubr.msk.f32.mxu1 %vm1161_vm2, %v1145_v42 }
 0x3c5   : > { %1832 = vmatmul.mubr.msk.f32.gmra.mrb[22].mxu1 %vm1161_vm2, %v1146_v43  ;;  %v1148_v51 = vmax.f32 %v1106_v45, 0.0 }
 0x3c6   : > { %v1147_v50 = vmax.f32 %v1101_v47, 0.0  ;;  %v1813_v44 = vpop.f32.mrb[26].mxu0 }
 0x3c7   : > { %v1116_v52 = vadd.f32 %v1813_v44, %v1602_v21  ;;  %v1110_v53 = vpop.f32.mrb[27].mxu0 }
 0x3c8   : > { %v1111_v54 = vadd.f32 %v1602_v21, %v1110_v53  ;;  %1834 = vmatprep.mubr.msk.f32.mxu1 %vm1161_vm2, %v1147_v50 }
 0x3c9   : > { %1835 = vmatmul.mubr.msk.f32.gmra.mrb[24].mxu1 %vm1161_vm2, %v1148_v51  ;;  %v1150_v61 = vmax.f32 %v1116_v52, 0.0 }
 0x3ca   : > { %v1149_v55 = vmax.f32 %v1111_v54, 0.0  ;;  %v1816_v60 = vpop.f32.mrb[28].mxu0 }
 0x3cb   : > { %v1126_v6 = vadd.f32 %v1816_v60, %v1602_v21  ;;  %v1120_v8 = vpop.f32.mrb[29].mxu0 }
 0x3cc   : > { %v1121_v10 = vadd.f32 %v1602_v21, %v1120_v8  ;;  %1837 = vmatprep.mubr.msk.f32.mxu1 %vm1161_vm2, %v1149_v55 }
 0x3cd   : > { %1838 = vmatmul.mubr.msk.f32.gmra.mrb[26].mxu1 %vm1161_vm2, %v1150_v61  ;;  %v1152_v56 = vmax.f32 %v1126_v6, 0.0 }
 0x3ce   : > { %v1151_v11 = vmax.f32 %v1121_v10, 0.0  ;;  %v1819_v38 = vpop.f32.mrb[30].mxu0 }
 0x3cf   : > { %v1136_v57 = vadd.f32 %v1819_v38, %v1602_v21  ;;  %v1130_v59 = vpop.f32.mrb[31].mxu0 }
 0x3d0   : > { %v1131_v62 = vadd.f32 %v1602_v21, %v1130_v59  ;;  %1840 = vmatprep.mubr.msk.f32.mxu1 %vm1161_vm2, %v1151_v11 }
 0x3d1   : > { %1841 = vmatmul.mubr.msk.f32.gmra.mrb[28].mxu1 %vm1161_vm2, %v1152_v56  ;;  %v1154_v5 = vmax.f32 %v1136_v57, 0.0 }
 0x3d2   : > { %v1153_v13 = vmax.f32 %v1131_v62, 0.0 }
 0x3d4   : > { %1843 = vmatprep.mubr.msk.f32.mxu1 %vm1161_vm2, %v1153_v13 }
 0x3d5   : > { %1844 = vmatmul.mubr.msk.f32.gmra.mrb[30].mxu1 %vm1161_vm2, %v1154_v5 }
 0x48c   : > { %v1824_v14 = vpop.f32.mrb[16].mxu1 }
 0x48d   : > { %v1282_v63 = vadd.f32 %v1824_v14, %v2563_v39  ;;  %v1276_v49 = vpop.f32.mrb[17].mxu1 }
 0x48e   : > { %v1277_v0 = vadd.f32 %v2563_v39, %v1276_v49 }
 0x48f   : > { %v1637_v16 = vmul.f32 -1.442695, %v1282_v63 }
 0x490   : > { %v1636_v4 = vmul.f32 -1.442695, %v1277_v0  ;;  %v1827_v17 = vpop.f32.mrb[18].mxu1 }
 0x491   : > { %2035 = vpow2.f32 %v1637_v16  ;;  %v1292_v33 = vadd.f32 %v1827_v17, %v2563_v39  ;;  %v1286_v9 = vpop.f32.mrb[19].mxu1 }
 0x492   : > { %2037 = vpow2.f32 %v1636_v4  ;;  %v1287_v48 = vadd.f32 %v2563_v39, %v1286_v9 }
 0x493   : > { %v1639_v18 = vmul.f32 -1.442695, %v1292_v33 }
 0x494   : > { %v1638_v12 = vmul.f32 -1.442695, %v1287_v48  ;;  %v1830_v15 = vpop.f32.mrb[20].mxu1 }
 0x495   : > { %2039 = vpow2.f32 %v1639_v18  ;;  %v1302_v58 = vadd.f32 %v1830_v15, %v2563_v39  ;;  %v1296_v21 = vpop.f32.mrb[21].mxu1 }
 0x496   : > { %2041 = vpow2.f32 %v1638_v12  ;;  %v1297_v2 = vadd.f32 %v2563_v39, %v1296_v21 }
 0x497   : > { %v1641_v22 = vmul.f32 -1.442695, %v1302_v58 }
 0x498   : > { %v1640_v1 = vmul.f32 -1.442695, %v1297_v2  ;;  %v1833_v3 = vpop.f32.mrb[22].mxu1 }
 0x499   : > { %2043 = vpow2.f32 %v1641_v22  ;;  %v1312_v20 = vadd.f32 %v1833_v3, %v2563_v39  ;;  %v1306_v26 = vpop.f32.mrb[23].mxu1 }
 0x49a   : > { %2045 = vpow2.f32 %v1640_v1  ;;  %v1307_v7 = vadd.f32 %v2563_v39, %v1306_v26 }
 0x49b   : > { %v2036_v27 = vpop.eup %2035  ;;  %v1643_v29 = vmul.f32 -1.442695, %v1312_v20 }
 0x49c   : > { %v2038_v23 = vpop.eup %2037  ;;  %v1404_v24 = vadd.f32 1.0, %v2036_v27  ;;  %v1642_v30 = vmul.f32 -1.442695, %v1307_v7  ;;  %v1836_v25 = vpop.f32.mrb[24].mxu1 }
 0x49d   : > { %v1403_v28 = vadd.f32 1.0, %v2038_v23  ;;  %2047 = vpow2.f32 %v1643_v29  ;;  %v1322_v31 = vadd.f32 %v1836_v25, %v2563_v39  ;;  %v1316_v32 = vpop.f32.mrb[25].mxu1 }
 0x49e   : > { %2049 = vrcp.f32 %v1404_v24  ;;  %v1317_v34 = vadd.f32 %v2563_v39, %v1316_v32 }
 0x49f   : > { %v2040_v35 = vpop.eup %2039  ;;  %2051 = vrcp.f32 %v1403_v28  ;;  %v1645_v36 = vmul.f32 -1.442695, %v1322_v31 }
 0x4a0   : > { %v2042_v40 = vpop.eup %2041  ;;  %v1406_v19 = vadd.f32 1.0, %v2040_v35  ;;  %2053 = vpow2.f32 %v1642_v30  ;;  %v1644_v41 = vmul.f32 -1.442695, %v1317_v34  ;;  %v1839_v42 = vpop.f32.mrb[26].mxu1 }
 0x4a1   : > { %v1405_v37 = vadd.f32 1.0, %v2042_v40  ;;  %2055 = vpow2.f32 %v1645_v36  ;;  %v1332_v43 = vadd.f32 %v1839_v42, %v2563_v39  ;;  %v1326_v45 = vpop.f32.mrb[27].mxu1 }
 0x4a2   : > { %2057 = vrcp.f32 %v1406_v19  ;;  %v1327_v46 = vadd.f32 %v2563_v39, %v1326_v45 }
 0x4a3   : > { %v2044_v47 = vpop.eup %2043  ;;  %2059 = vrcp.f32 %v1405_v37  ;;  %v1647_v50 = vmul.f32 -1.442695, %v1332_v43 }
 0x4a4   : > { %v2046_v44 = vpop.eup %2045  ;;  %v1408_v51 = vadd.f32 1.0, %v2044_v47  ;;  %2061 = vpow2.f32 %v1644_v41  ;;  %v1646_v52 = vmul.f32 -1.442695, %v1327_v46  ;;  %v1842_v53 = vpop.f32.mrb[28].mxu1 }
 0x4a5   : > { %v1407_v54 = vadd.f32 1.0, %v2046_v44  ;;  %2063 = vpow2.f32 %v1647_v50  ;;  %v1342_v55 = vadd.f32 %v1842_v53, %v2563_v39  ;;  %v1336_v60 = vpop.f32.mrb[29].mxu1 }
 0x4a6   : > { %2065 = vrcp.f32 %v1408_v51  ;;  %v1337_v61 = vadd.f32 %v2563_v39, %v1336_v60 }
 0x4a7   : > { %v2048_v6 = vpop.eup %2047  ;;  %2067 = vrcp.f32 %v1407_v54  ;;  %v1649_v8 = vmul.f32 -1.442695, %v1342_v55 }
 0x4a8   : > { %v2050_v10 = vpop.eup %2049  ;;  %v1410_v11 = vadd.f32 1.0, %v2048_v6  ;;  %2069 = vpow2.f32 %v1646_v52  ;;  %v1648_v38 = vmul.f32 -1.442695, %v1337_v61  ;;  %v1845_v56 = vpop.f32.mrb[30].mxu1 }
 0x4a9   : > { %v2052_v57 = vpop.eup %2051  ;;  %1452 = vst [vmem:[%s2582_s22 + $0x8] sm:$0xff] %v2050_v10  ;;  %2071 = vpow2.f32 %v1649_v8  ;;  %v1352_v59 = vadd.f32 %v1845_v56, %v2563_v39  ;;  %v1346_v62 = vpop.f32.mrb[31].mxu1 }
 0x4aa   : > { %v2054_v13 = vpop.eup %2053  ;;  %1451 = vst [vmem:[%s2582_s22] sm:$0xff] %v2052_v57  ;;  %2073 = vrcp.f32 %v1410_v11  ;;  %v1347_v5 = vadd.f32 %v2563_v39, %v1346_v62 }
 0x4ab   : > { %v2056_v14 = vpop.eup %2055  ;;  %v1409_v63 = vadd.f32 1.0, %v2054_v13  ;;  %2075 = vpow2.f32 %v1648_v38  ;;  %v1651_v49 = vmul.f32 -1.442695, %v1352_v59 }
 0x4ac   : > { %v2058_v0 = vpop.eup %2057  ;;  %v1412_v16 = vadd.f32 1.0, %v2056_v14  ;;  %v1650_v4 = vmul.f32 -1.442695, %v1347_v5 }
 0x4ad   : > { %v2060_v17 = vpop.eup %2059  ;;  %1454 = vst [vmem:[%s2582_s22 + $0x18] sm:$0xff] %v2058_v0  ;;  %2077 = vrcp.f32 %v1409_v63 }
 0x4ae   : > { %v2062_v33 = vpop.eup %2061  ;;  %1453 = vst [vmem:[%s2582_s22 + $0x10] sm:$0xff] %v2060_v17  ;;  %2079 = vrcp.f32 %v1412_v16 }
 0x4af   : > { %v2064_v9 = vpop.eup %2063  ;;  %v1411_v48 = vadd.f32 1.0, %v2062_v33  ;;  %2081 = vpow2.f32 %v1651_v49 }
 0x4b0   : > { %v2066_v39 = vpop.eup %2065  ;;  %v1414_v18 = vadd.f32 1.0, %v2064_v9  ;;  %2083 = vpow2.f32 %v1650_v4 }
 0x4b1   : > { %v2068_v12 = vpop.eup %2067  ;;  %1456 = vst [vmem:[%s2582_s22 + $0x28] sm:$0xff] %v2066_v39  ;;  %2085 = vrcp.f32 %v1411_v48 }
 0x4b2   : > { %v2070_v15 = vpop.eup %2069  ;;  %1455 = vst [vmem:[%s2582_s22 + $0x20] sm:$0xff] %v2068_v12  ;;  %2087 = vrcp.f32 %v1414_v18 }
 0x4b3   : > { %v2072_v58 = vpop.eup %2071  ;;  %v1413_v21 = vadd.f32 1.0, %v2070_v15 }
 0x4b4   : > { %v2074_v2 = vpop.eup %2073  ;;  %v1416_v22 = vadd.f32 1.0, %v2072_v58 }
 0x4b5   : > { %v2076_v1 = vpop.eup %2075  ;;  %1458 = vst [vmem:[%s2582_s22 + $0x38] sm:$0xff] %v2074_v2  ;;  %2089 = vrcp.f32 %v1413_v21 }
 0x4b6   : > { %2091 = vrcp.f32 %v1416_v22  ;;  %v1415_v3 = vadd.f32 1.0, %v2076_v1 }
 0x4b7   : > { %v2078_v20 = vpop.eup %2077 }
 0x4b8   : > { %v2080_v26 = vpop.eup %2079  ;;  %1457 = vst [vmem:[%s2582_s22 + $0x30] sm:$0xff] %v2078_v20  ;;  %2093 = vrcp.f32 %v1415_v3 }
 0x4b9   : > { %v2082_v7 = vpop.eup %2081  ;;  %1460 = vst [vmem:[%s2582_s22 + $0x48] sm:$0xff] %v2080_v26 }
 0x4ba   : > { %v2084_v27 = vpop.eup %2083  ;;  %v1418_v29 = vadd.f32 1.0, %v2082_v7 }
 0x4bb   : > { %v2086_v23 = vpop.eup %2085  ;;  %v1417_v24 = vadd.f32 1.0, %v2084_v27 }
 0x4bc   : > { %v2088_v30 = vpop.eup %2087  ;;  %1459 = vst [vmem:[%s2582_s22 + $0x40] sm:$0xff] %v2086_v23  ;;  %2095 = vrcp.f32 %v1418_v29 }
 0x4bd   : > { %1462 = vst [vmem:[%s2582_s22 + $0x58] sm:$0xff] %v2088_v30  ;;  %2097 = vrcp.f32 %v1417_v24 }
 0x4bf   : > { %v2090_v25 = vpop.eup %2089 }
 0x4c0   : > { %v2092_v28 = vpop.eup %2091  ;;  %1461 = vst [vmem:[%s2582_s22 + $0x50] sm:$0xff] %v2090_v25 }
 0x4c1   : > { %1464 = vst [vmem:[%s2582_s22 + $0x68] sm:$0xff] %v2092_v28 }
 0x4c2   : > { %v2094_v31 = vpop.eup %2093 }
 0x4c3   : > { %1463 = vst [vmem:[%s2582_s22 + $0x60] sm:$0xff] %v2094_v31 }
 0x4c6   : > { %v2096_v32 = vpop.eup %2095 }
 0x4c7   : > { %v2098_v34 = vpop.eup %2097  ;;  %1466 = vst [vmem:[%s2582_s22 + $0x78] sm:$0xff] %v2096_v32 }
 0x4c8   : > { %1465 = vst [vmem:[%s2582_s22 + $0x70] sm:$0xff] %v2098_v34 }
 0x4c9   : > { %2112 = shalt.err (!%p2109_p3)
}
 0x4ca   : > { %s2113_s4 = scalar_lea.hbm %s2605_s27, 2048  ;;  %s2117_s7 = scalar_lea.hbm %s2656_s2, 4096 }
 0x4cb   : > { %p2114_p4 = scmp.ne.s32.totalorder %s2605_s27, %s2113_s4  ;;  %p2118_p9 = scmp.lt.u32.totalorder %s2605_s27, %s2656_s2 }
 0x4cc   : > { %p2119_p10 = scmp.lt.u32.totalorder %s2117_s7, %s2113_s4  ;;  %p2121_p12 = scmp.lt.u32.totalorder %s2113_s4, %s2605_s27 }
 0x4cd   : > { %p2115_p7 = pnand %p2114_p4, %p2221_p5 }
 0x4ce   : > { %p2120_p11 = por %p2119_p10, %p2118_p9 }
 0x4cf   : > { %p2116_p8 = pneg %p2115_p7 }
 0x4d0   : > { %p2122_p13 = por %p2121_p12, %p2120_p11 }
 0x4d2   : > { %p2123_p0 = pnand %p2122_p13, %p2116_p8 }
 0x4d4   : > { %2126 = shalt.err (!%p2123_p0)
}
 0x4d5   : > { %s2166_s16 = smov 128   ;;  %s2167_s17 = smov 8  }
 0x4d6   : > { %1862 = dma.vmem_to_hbm [thread:$0]  (%p2221_p5), %s2607_s24, 2048, %s2605_s27, %s2613_s28, %s2166_s16, %s2166_s16, %s2167_s17  }
 0x4d7 PF: > { %p1868_p1 = scmp.ge.s32.totalorder %s2161_s12, 2  ;;  %s1496_s21 = sand.u32 1, %s2149_s9  }
 0x4d8   : > { %s1497_s22 = scalar_lea.sflag [#allocation3], %s1496_s21 }
 0x4d9   : > { %p1865_p2 = pnand %p1868_p1, %p2225_p6 }
 0x4db   : > { %2144 = dma.done.wait (!%p1865_p2), %s1497_s22, 2048  }
 0x4dc   : > { %2146 = vsyncadd (!%p1865_p2), %s1497_s22, 4294965248  ;;  %p12_p3 = scmp.ge.s32.totalorder %s2208_s15, 4   ;;  %s2659_s9 = smov %s2153_s10 }
 0x4dd   : > { %s2660_s10 = smov %s2157_s11  ;;  %s2661_s11 = smov %s2219_s18 }
 0x4de   : > { %s2662_s12 = smov %s2208_s15  ;;  %14 = sbr.rel (!%p12_p3) target bundleno = 3 (0x3), region = 63 }
 0x4e5   :  { %1502 = vsyncpa [#allocation3], 1 }
 0x4e6   :  { %1504 = vsyncpa [#allocation3 + $0x1], 1 }

</bundles_post_ra>
